<compile_context>
chip_gen: v6e
topology: v6e:2x2x1
jax: 0.10.0
libtpu: 0.0.40
codegen_flags: <defaults>
</compile_context>

<pallas_src>
import functools

import jax
import jax.numpy as jnp
from jax.experimental import pallas as pl
from jax.experimental.pallas import tpu as pltpu


def _round_up(v, m):
    return ((v + m - 1) // m) * m


def _num_tensorcores_per_chip():
    """2 TensorCores on v7x; 1 on v5e/v6e (and anything we can't identify)."""
    try:
        kind = jax.devices()[0].device_kind.lower()
    except Exception:
        return 1
    return 2 if "v7" in kind else 1


def generator_kernel(x_ref, w1_ref, b1_ref, w2_ref, b2_ref, o_ref):
    # Layer 1: cast the f32 input tile to bf16 for the MXU, accumulate in f32.
    x = x_ref[...].astype(w1_ref.dtype)                       # (tm, 64) bf16
    h = jnp.dot(x, w1_ref[...], preferred_element_type=jnp.float32)
    h = h + b1_ref[...]                                        # f32 bias broadcast
    h = jnp.maximum(h, jnp.float32(0.01) * h)                  # LeakyReLU(0.01)
    # Layer 2: bf16 activations into the MXU, f32 accumulate.
    y = jnp.dot(h.astype(w2_ref.dtype), w2_ref[...],
                preferred_element_type=jnp.float32)
    y = y + b2_ref[...]
    # tanh in f32 (v5e-safe), bf16 store (halves HBM writeback).
    o_ref[...] = jnp.tanh(y).astype(o_ref.dtype)


@functools.partial(jax.jit, static_argnames=("tm", "grid_m"))
def _forward_impl(x, w1_b, b1_f, w2_p, b2_p, *, tm, grid_m):
    batch, z_dim = x.shape
    hidden = w1_b.shape[1]
    n_pad = w2_p.shape[1]
    m_pad = tm * grid_m
    if m_pad != batch:
        x = jnp.pad(x, ((0, m_pad - batch), (0, 0)))

    cost = pl.CostEstimate(
        flops=2 * m_pad * (z_dim * hidden + hidden * n_pad),
        transcendentals=m_pad * n_pad,
        bytes_accessed=(m_pad * z_dim * 4 + w1_b.size * 2 + w2_p.size * 2
                        + b1_f.size * 4 + b2_p.size * 4 + m_pad * n_pad * 2),
    )

    return pl.pallas_call(
        generator_kernel,
        out_shape=jax.ShapeDtypeStruct((m_pad, n_pad), jnp.bfloat16),
        grid=(grid_m,),
        in_specs=[
            pl.BlockSpec((tm, z_dim), lambda i: (i, 0)),       # x row tile (f32)
            pl.BlockSpec((z_dim, hidden), lambda i: (0, 0)),   # w1 resident (bf16)
            pl.BlockSpec((1, hidden), lambda i: (0, 0)),       # b1 resident (f32)
            pl.BlockSpec((hidden, n_pad), lambda i: (0, 0)),   # w2 resident (bf16)
            pl.BlockSpec((1, n_pad), lambda i: (0, 0)),        # b2 resident (f32)
        ],
        out_specs=pl.BlockSpec((tm, n_pad), lambda i: (i, 0)),
        compiler_params=pltpu.CompilerParams(
            dimension_semantics=("parallel",),
        ),
        cost_estimate=cost,
    )(x, w1_b, b1_f, w2_p, b2_p)


def prepare_params(w1, b1, w2, b2):
    """One-time pad + cast of the weights (do NOT redo this per step)."""
    z_dim, hidden = w1.shape
    img_dim = w2.shape[1]
    n_pad = _round_up(img_dim, 128)                            # 784 -> 896
    w1_b = w1.astype(jnp.bfloat16)                             # (64, 256), no K pad
    b1_f = jnp.asarray(b1, jnp.float32).reshape(1, hidden)
    w2_p = jnp.zeros((hidden, n_pad), jnp.bfloat16).at[:, :img_dim].set(
        w2.astype(jnp.bfloat16))
    b2_p = jnp.zeros((1, n_pad), jnp.float32).at[:, :img_dim].set(
        jnp.asarray(b2, jnp.float32).reshape(1, img_dim))
    return dict(w1=w1_b, b1=b1_f, w2=w2_p, b2=b2_p, img_dim=img_dim)


def generator_forward(x, params, *, num_row_tiles=None, max_block_m=1024):
    """x: (batch, z_dim) f32 -> (batch, img_dim) bf16."""
    batch = x.shape[0]
    if num_row_tiles is None:
        # One fat tile on 1-TC chips; two tiles on v7x so both cores work.
        num_row_tiles = _num_tensorcores_per_chip() if batch >= 16 else 1
    num_row_tiles = max(1, min(num_row_tiles, max(1, batch // 8)))

    if num_row_tiles == 1:
        tm = batch                                  # full dim -> legal block, no row pad
    else:
        tm = _round_up(-(-batch // num_row_tiles), 8)
    if tm > max_block_m:                            # cap per-tile VMEM for huge batches
        tm = max_block_m
        num_row_tiles = -(-batch // tm)

    out = _forward_impl(x, params["w1"], params["b1"], params["w2"], params["b2"],
                        tm=tm, grid_m=num_row_tiles)
    # Drop batch/lane padding (padded weight/bias columns were zero).
    return out[:batch, :params["img_dim"]]


def init_params(key, z_dim, hidden, img_dim, dtype=jnp.float32):
    """PyTorch nn.Linear default init: U(-1/sqrt(fan_in), 1/sqrt(fan_in))."""
    k1, k2, k3, k4 = jax.random.split(key, 4)
    bound1 = 1.0 / (z_dim ** 0.5)
    bound2 = 1.0 / (hidden ** 0.5)
    w1 = jax.random.uniform(k1, (z_dim, hidden), dtype, -bound1, bound1)
    b1 = jax.random.uniform(k2, (1, hidden), dtype, -bound1, bound1)
    w2 = jax.random.uniform(k3, (hidden, img_dim), dtype, -bound2, bound2)
    b2 = jax.random.uniform(k4, (1, img_dim), dtype, -bound2, bound2)
    return w1, b1, w2, b2


def _reference(x, w1, b1, w2, b2):
    """Pure-JAX reference with the same bf16-in / f32-accumulate / bf16-out recipe."""
    h = jnp.dot(x.astype(jnp.bfloat16), w1.astype(jnp.bfloat16),
                preferred_element_type=jnp.float32) + b1.reshape(1, -1)
    h = jnp.maximum(h, 0.01 * h)
    y = jnp.dot(h.astype(jnp.bfloat16), w2.astype(jnp.bfloat16),
                preferred_element_type=jnp.float32) + b2.reshape(1, -1)
    return jnp.tanh(y).astype(jnp.bfloat16)


if __name__ == "__main__":
    z_dim = 64          # as in the reference script
    hidden = 256        # fixed by the module
    img_dim = 784       # 28*28 MNIST-style generator output

    key = jax.random.PRNGKey(0)
    k_x, k_x2, k_p = jax.random.split(key, 3)
    w1, b1, w2, b2 = init_params(k_p, z_dim, hidden, img_dim)
    params = prepare_params(w1, b1, w2, b2)   # one-time pad/cast

    # Small-shape check (single tile, no padding anywhere on the row axis).
    batch = 8
    x = jax.random.normal(k_x, (batch, z_dim), jnp.float32)
    out = jax.block_until_ready(generator_forward(x, params))
    ref = _reference(x, w1, b1, w2, b2)
    assert out.shape == (batch, img_dim) and out.dtype == jnp.bfloat16
    assert float(jnp.max(jnp.abs(out.astype(jnp.float32)
                                 - ref.astype(jnp.float32)))) < 1e-2

    # Multi-tile (grid) path: batch 256 split into 2 row tiles (v7x-style).
    batch2 = 256
    x2 = jax.random.normal(k_x2, (batch2, z_dim), jnp.float32)
    out2 = jax.block_until_ready(generator_forward(x2, params, num_row_tiles=2))
    ref2 = _reference(x2, w1, b1, w2, b2)
    assert out2.shape == (batch2, img_dim)
    assert float(jnp.max(jnp.abs(out2.astype(jnp.float32)
                                 - ref2.astype(jnp.float32)))) < 1e-2

    print("KERNEL_OK")
</pallas_src>

<mosaic_0001>
module attributes {stable_mosaic.version = 11 : i64} {
  func.func @generator_kernel(%arg0: i32, %arg1: memref<8x64xf32, #tpu.memory_space<vmem>>, %arg2: memref<64x256xbf16, #tpu.memory_space<vmem>>, %arg3: memref<1x256xf32, #tpu.memory_space<vmem>>, %arg4: memref<256x896xbf16, #tpu.memory_space<vmem>>, %arg5: memref<1x896xf32, #tpu.memory_space<vmem>>, %arg6: memref<8x896xbf16, #tpu.memory_space<vmem>>) attributes {dimension_semantics = [#tpu.dimension_semantics<parallel>], iteration_bounds = array<i64: 1>, scalar_prefetch = 0 : i64, scratch_operands = 0 : i64, tpu.core_type = #tpu.core_type<tc>, window_params = [{transform_indices = @transform_0, window_bounds = array<i64: 8, 64>}, {pipeline_mode = #tpu.pipeline_mode<synchronous>, transform_indices = @transform_1, window_bounds = array<i64: 64, 256>}, {pipeline_mode = #tpu.pipeline_mode<synchronous>, transform_indices = @transform_2, window_bounds = array<i64: 1, 256>}, {pipeline_mode = #tpu.pipeline_mode<synchronous>, transform_indices = @transform_3, window_bounds = array<i64: 256, 896>}, {pipeline_mode = #tpu.pipeline_mode<synchronous>, transform_indices = @transform_4, window_bounds = array<i64: 1, 896>}, {transform_indices = @transform_5, window_bounds = array<i64: 8, 896>}]} {
    %c0 = arith.constant 0 : index
    %c0_0 = arith.constant 0 : index
    %0 = vector.load %arg1[%c0, %c0_0] : memref<8x64xf32, #tpu.memory_space<vmem>>, vector<8x64xf32>
    %1 = arith.truncf %0 : vector<8x64xf32> to vector<8x64xbf16>
    %c0_1 = arith.constant 0 : index
    %c0_2 = arith.constant 0 : index
    %2 = vector.load %arg2[%c0_1, %c0_2] : memref<64x256xbf16, #tpu.memory_space<vmem>>, vector<64x256xbf16>
    %cst = arith.constant dense<0.000000e+00> : vector<8x256xf32>
    %3 = tpu.matmul %1, %2, %cst {dimension_numbers = #tpu.dot_dimension_numbers<[1], [0], [0], [1], [0, 0, 1, 1], [], []>} : vector<8x64xbf16>, vector<64x256xbf16>, vector<8x256xf32> -> vector<8x256xf32>
    %c0_3 = arith.constant 0 : index
    %c0_4 = arith.constant 0 : index
    %4 = vector.load %arg3[%c0_3, %c0_4] : memref<1x256xf32, #tpu.memory_space<vmem>>, vector<1x256xf32>
    %5 = vector.broadcast %4 : vector<1x256xf32> to vector<8x256xf32>
    %6 = arith.addf %3, %5 : vector<8x256xf32>
    %cst_5 = arith.constant 0.00999999977 : f32
    %7 = vector.broadcast %cst_5 : f32 to vector<8x256xf32>
    %8 = arith.mulf %7, %6 : vector<8x256xf32>
    %9 = arith.maximumf %6, %8 : vector<8x256xf32>
    %10 = arith.truncf %9 : vector<8x256xf32> to vector<8x256xbf16>
    %c0_6 = arith.constant 0 : index
    %c0_7 = arith.constant 0 : index
    %11 = vector.load %arg4[%c0_6, %c0_7] : memref<256x896xbf16, #tpu.memory_space<vmem>>, vector<256x896xbf16>
    %cst_8 = arith.constant dense<0.000000e+00> : vector<8x896xf32>
    %12 = tpu.matmul %10, %11, %cst_8 {dimension_numbers = #tpu.dot_dimension_numbers<[1], [0], [0], [1], [0, 0, 1, 1], [], []>} : vector<8x256xbf16>, vector<256x896xbf16>, vector<8x896xf32> -> vector<8x896xf32>
    %c0_9 = arith.constant 0 : index
    %c0_10 = arith.constant 0 : index
    %13 = vector.load %arg5[%c0_9, %c0_10] : memref<1x896xf32, #tpu.memory_space<vmem>>, vector<1x896xf32>
    %14 = vector.broadcast %13 : vector<1x896xf32> to vector<8x896xf32>
    %15 = arith.addf %12, %14 : vector<8x896xf32>
    %16 = math.tanh %15 : vector<8x896xf32>
    %17 = arith.truncf %16 : vector<8x896xf32> to vector<8x896xbf16>
    %c0_11 = arith.constant 0 : index
    %c0_12 = arith.constant 0 : index
    %18 = vector.load %arg6[%c0_11, %c0_12] : memref<8x896xbf16, #tpu.memory_space<vmem>>, vector<8x896xbf16>
    tpu.vector_store %arg6[%c0_11, %c0_12], %17 {strides = array<i32>} : memref<8x896xbf16, #tpu.memory_space<vmem>>, vector<8x896xbf16>,
    return
  }
  func.func @transform_0(%arg0: i32) -> (i32, i32) {
    %c0_i32 = arith.constant 0 : i32
    %c0_i32_0 = arith.constant 0 : i32
    return %arg0, %c0_i32 : i32, i32
  }
  func.func @transform_1(%arg0: i32) -> (i32, i32) {
    %c0_i32 = arith.constant 0 : i32
    %c0_i32_0 = arith.constant 0 : i32
    %c0_i32_1 = arith.constant 0 : i32
    return %c0_i32, %c0_i32_0 : i32, i32
  }
  func.func @transform_2(%arg0: i32) -> (i32, i32) {
    %c0_i32 = arith.constant 0 : i32
    %c0_i32_0 = arith.constant 0 : i32
    %c0_i32_1 = arith.constant 0 : i32
    return %c0_i32, %c0_i32_0 : i32, i32
  }
  func.func @transform_3(%arg0: i32) -> (i32, i32) {
    %c0_i32 = arith.constant 0 : i32
    %c0_i32_0 = arith.constant 0 : i32
    %c0_i32_1 = arith.constant 0 : i32
    return %c0_i32, %c0_i32_0 : i32, i32
  }
  func.func @transform_4(%arg0: i32) -> (i32, i32) {
    %c0_i32 = arith.constant 0 : i32
    %c0_i32_0 = arith.constant 0 : i32
    %c0_i32_1 = arith.constant 0 : i32
    return %c0_i32, %c0_i32_0 : i32, i32
  }
  func.func @transform_5(%arg0: i32) -> (i32, i32) {
    %c0_i32 = arith.constant 0 : i32
    %c0_i32_0 = arith.constant 0 : i32
    return %arg0, %c0_i32 : i32, i32
  }
}

</mosaic_0001>

<bundles_post_ra>
// kernel: _forward_impl.1
= control target key start
LH: loop header
LB: loop body
LE: loop exit
PB: predicated region body
PF: predicated region fallthrough
CT: control target
= control target key end

     0   :  { %10 = vsyncpa [#allocation3], 0  ;;  %s1683_s0 = inlined_call_operand.hbm [shape: f32[8,64], index: 0, kind: input, shape index: {}]   ;;  %s1684_s1 = inlined_call_operand.hbm [shape: bf16[64,256], index: 1, kind: input, shape index: {}]   ;;  %s1685_s2 = inlined_call_operand.hbm [shape: f32[1,256], index: 2, kind: input, shape index: {}]   ;;  %s1686_s3 = inlined_call_operand.hbm [shape: bf16[256,896], index: 3, kind: input, shape index: {}]   ;;  %s1687_s4 = inlined_call_operand.vmem [shape: f32[1,896], index: 4, kind: input, shape index: {}]   ;;  %s1688_s5 = inlined_call_operand.hbm [shape: bf16[8,896], index: 5, kind: output, shape index: {}]  }
   0x1   :  { %11 = vsyncpa [#allocation6], 0 }
   0x2   :  { %12 = vsyncpa [#allocation9], 0 }
   0x3   :  { %13 = vsyncpa [#allocation4], 0  ;;  %s1602_s18 = smov [#allocation5]  }
   0x4   :  { %s29_s19 = sshll.u32 %s1602_s18, 4  ;;  %s30_s19 = int_to_ptr.vmem [resolvable:$true] %s29_s19 }
   0x5   :  { %s1502_s20 = scalar_lea.vmem %s30_s19, 1024  ;;  %p1507_p1 = scmp.lt.s32.totalorder %s30_s19, %s30_s19 }
   0x6   :  { %p1503_p0 = scmp.ne.s32.totalorder %s30_s19, %s1502_s20  ;;  %p1508_p2 = scmp.lt.s32.totalorder %s1502_s20, %s1502_s20 }
   0x8   :  { %p1509_p3 = por %p1508_p2, %p1507_p1 }
   0xa   :  { %p1510_p4 = pnand %p1509_p3, %p1503_p0 }
   0xc   :  { %1513 = shalt.err (!%p1510_p4)
}
   0xd   :  { %s1603_s21 = smov 128   ;;  %s1604_s22 = smov 8  }
   0xe   :  { %35 = dma.hbm_to_vmem [thread:$0]  %s1684_s1, 1024, %s30_s19, [#allocation6], %s1603_s21, %s1603_s21, %s1604_s22  }
   0xf   :  { %s1605_s25 = smov [#allocation2]   ;;  %s1606_s27 = smov [#allocation7]  }
  0x10   :  { %s20_s26 = sshll.u32 %s1605_s25, 4  ;;  %s42_s28 = sshll.u32 %s1606_s27, 4  ;;  %s21_s26 = int_to_ptr.vmem [resolvable:$true] %s20_s26  ;;  %s43_s28 = int_to_ptr.vmem [resolvable:$true] %s42_s28 }
  0x11   :  { %s1522_s29 = scalar_lea.vmem %s21_s26, 128  ;;  %p1527_p6 = scmp.lt.s32.totalorder %s21_s26, %s21_s26 }
  0x12   :  { %p1523_p5 = scmp.ne.s32.totalorder %s21_s26, %s1522_s29  ;;  %p1528_p7 = scmp.lt.s32.totalorder %s1522_s29, %s1522_s29 }
  0x14   :  { %p1529_p8 = por %p1528_p7, %p1527_p6 }
  0x16   :  { %p1530_p9 = pnand %p1529_p8, %p1523_p5 }
  0x18   :  { %1533 = shalt.err (!%p1530_p9)
}
  0x19   :  { %23 = dma.hbm_to_vmem [thread:$0]  %s1683_s0, 128, %s21_s26, [#allocation3]  }
  0x1a   :  { %s1542_s7 = scalar_lea.vmem %s43_s28, 32  ;;  %p1547_p11 = scmp.lt.s32.totalorder %s43_s28, %s43_s28 }
  0x1b   :  { %p1543_p10 = scmp.ne.s32.totalorder %s43_s28, %s1542_s7  ;;  %p1548_p12 = scmp.lt.s32.totalorder %s1542_s7, %s1542_s7 }
  0x1d   :  { %p1549_p13 = por %p1548_p12, %p1547_p11 }
  0x1f   :  { %p1550_p0 = pnand %p1549_p13, %p1543_p10 }
  0x21   :  { %1553 = shalt.err (!%p1550_p0)
}
  0x22   :  { %45 = dma.hbm_to_vmem [thread:$0]  %s1685_s2, 32, %s43_s28, [#allocation6]  }
  0x23   :  { %s1607_s9 = smov [#allocation8]  }
  0x24   :  { %s51_s10 = sshll.u32 %s1607_s9, 4  ;;  %s52_s10 = int_to_ptr.vmem [resolvable:$true] %s51_s10 }
  0x25   :  { %s1562_s11 = scalar_lea.vmem %s52_s10, 14336  ;;  %p1567_p2 = scmp.lt.s32.totalorder %s52_s10, %s52_s10 }
  0x26   :  { %p1563_p1 = scmp.ne.s32.totalorder %s52_s10, %s1562_s11  ;;  %p1568_p3 = scmp.lt.s32.totalorder %s1562_s11, %s1562_s11 }
  0x28   :  { %p1569_p4 = por %p1568_p3, %p1567_p2 }
  0x2a   :  { %p1570_p5 = pnand %p1569_p4, %p1563_p1 }
  0x2c   :  { %1573 = shalt.err (!%p1570_p5)
}
  0x2d   :  { %s1608_s0 = smov 448   ;;  %s1609_s12 = smov 28  }
  0x2e   :  { %57 = dma.hbm_to_vmem [thread:$0]  %s1686_s3, 14336, %s52_s10, [#allocation9], %s1608_s0, %s1608_s0, %s1609_s12  }
  0x2f   :  { %1594 = dma.done.wait [#allocation3], 128  }
  0x30   :  { %1595 = vsyncadd [#allocation3], 4294967168 }
  0x31   :  { %1596 = dma.done.wait [#allocation6], 1056  }
  0x32   :  { %1597 = vsyncadd [#allocation6], 4294966240 }
  0x33   :  { %1598 = dma.done.wait [#allocation9], 14336  }
  0x34   :  { %1599 = vsyncadd [#allocation9], 4294952960  ;;  %v1610_v0 = vmov 0   ;;  %v1308_v1 = vld [vmem:[#allocation5 + $0x34] ss:$8 sps:$4 sm:$0xff]   ;;  %vm135_vm0 = vcmask 523264  }
  0x35   :  { %171 = vmatprep.mubr.bf16.mxu0 %v1610_v0  ;;  %v1310_v2 = vld [vmem:[#allocation5 + $0x30] ss:$8 sps:$4 sm:$0xff]   ;;  %147 = vmatprep.subr.bf16.mxu0 %v1308_v1  ;;  %v1311_v3 = vld [vmem:[#allocation5 + $0x24] ss:$8 sps:$4 sm:$0xff]   ;;  %v1313_v4 = vld [vmem:[#allocation5 + $0x20] ss:$8 sps:$4 sm:$0xff]  }
  0x36   :  { %148 = vmatpush1.bf16.msra.mxu0 %v1310_v2  ;;  %v1314_v5 = vld [vmem:[#allocation5 + $0x14] ss:$8 sps:$4 sm:$0xff]   ;;  %v1320_v6 = vld [vmem:[#allocation8 + $0x18c] ss:$28 sps:$4 sm:$0xff]   ;;  %v1338_v19 = vld [vmem:[#allocation8 + $0xe4] ss:$28 sps:$4 sm:$0xff]  }
  0x37   :  { %149 = vmatprep.subr.bf16.mxu0 %v1311_v3  ;;  %v1316_v7 = vld [vmem:[#allocation5 + $0x10] ss:$8 sps:$4 sm:$0xff]   ;;  %v1317_v8 = vld [vmem:[#allocation5 + $0x4] ss:$8 sps:$4 sm:$0xff]   ;;  %927 = vmatprep.subr.bf16.mxu1 %v1320_v6  ;;  %v1319_v11 = vld [vmem:[#allocation5] ss:$8 sps:$4 sm:$0xff]  }
  0x38   :  { %v1325_v9 = vld [vmem:[#allocation8 + $0x188] ss:$28 sps:$4 sm:$0xff]   ;;  %v1326_v10 = vld [vmem:[#allocation8 + $0x154] ss:$28 sps:$4 sm:$0xff]   ;;  %v1332_v14 = vld [vmem:[#allocation8 + $0x11c] ss:$28 sps:$4 sm:$0xff]  }
  0x39   :  { %v73_v12 = vld [vmem:[#allocation2] sm:$0xff]  ;;  %928 = vmatpush1.bf16.msra.mxu1 %v1325_v9  ;;  %v1331_v13 = vld [vmem:[#allocation8 + $0x150] ss:$28 sps:$4 sm:$0xff]   ;;  %v1336_v24 = vld [vmem:[#allocation8 + $0x124] ss:$28 sps:$4 sm:$0xff]  }
  0x3a   :  { %150 = vmatpush1.bf16.msra.mxu0 %v1313_v4  ;;  %929 = vmatprep.subr.bf16.mxu1 %v1326_v10  ;;  %v1324_v15 = vld [vmem:[#allocation8 + $0x194] ss:$28 sps:$4 sm:$0xff]   ;;  %v74_v16 = vpack.c.bf16 %v73_v12, %v73_v12  ;;  %v1330_v20 = vld [vmem:[#allocation8 + $0x15c] ss:$28 sps:$4 sm:$0xff]   ;;  %v1344_v23 = vld [vmem:[#allocation8 + $0xac] ss:$28 sps:$4 sm:$0xff]  }
  0x3b   :  { %151 = vmatprep.subr.bf16.mxu0 %v1314_v5  ;;  %v1337_v17 = vld [vmem:[#allocation8 + $0x118] ss:$28 sps:$4 sm:$0xff]   ;;  %v1322_v18 = vld [vmem:[#allocation8 + $0x190] ss:$28 sps:$4 sm:$0xff]   ;;  %v1343_v22 = vld [vmem:[#allocation8 + $0xe0] ss:$28 sps:$4 sm:$0xff]  }
  0x3c   :  { %v1328_v21 = vld [vmem:[#allocation8 + $0x158] ss:$28 sps:$4 sm:$0xff]   ;;  %v1349_v25 = vld [vmem:[#allocation8 + $0xa8] ss:$28 sps:$4 sm:$0xff]   ;;  %v1334_v26 = vld [vmem:[#allocation8 + $0x120] ss:$28 sps:$4 sm:$0xff]  }
  0x3d   :  { %930 = vmatpush1.bf16.msra.mxu1 %v1331_v13  ;;  %v1350_v27 = vld [vmem:[#allocation8 + $0x74] ss:$28 sps:$4 sm:$0xff]   ;;  %v1342_v28 = vld [vmem:[#allocation8 + $0xec] ss:$28 sps:$4 sm:$0xff]   ;;  %v1356_v31 = vld [vmem:[#allocation8 + $0x3c] ss:$28 sps:$4 sm:$0xff]   ;;  %v85_v13 = vlaneseq }
  0x3e   :  { %152 = vmatpush1.bf16.msra.mxu0 %v1316_v7  ;;  %931 = vmatprep.subr.bf16.mxu1 %v1332_v14  ;;  %v1340_v29 = vld [vmem:[#allocation8 + $0xe8] ss:$28 sps:$4 sm:$0xff]   ;;  %v1355_v30 = vld [vmem:[#allocation8 + $0x70] ss:$28 sps:$4 sm:$0xff]   ;;  %v1361_v33 = vld [vmem:[#allocation8 + $0x38] ss:$28 sps:$4 sm:$0xff]  }
  0x3f   :  { %153 = vmatprep.subr.bf16.mxu0 %v1317_v8  ;;  %v1348_v32 = vld [vmem:[#allocation8 + $0xb4] ss:$28 sps:$4 sm:$0xff]   ;;  %v1362_v35 = vld [vmem:[#allocation8 + $0x4] ss:$28 sps:$4 sm:$0xff]   ;;  %v1354_v36 = vld [vmem:[#allocation8 + $0x7c] ss:$28 sps:$4 sm:$0xff]  }
  0x40   :  { %v1346_v34 = vld [vmem:[#allocation8 + $0xb0] ss:$28 sps:$4 sm:$0xff]   ;;  %v1352_v37 = vld [vmem:[#allocation8 + $0x78] ss:$28 sps:$4 sm:$0xff]   ;;  %v1367_v38 = vld [vmem:[#allocation8] ss:$28 sps:$4 sm:$0xff]  }
  0x41   :  { %932 = vmatpush1.bf16.msra.mxu1 %v1337_v17  ;;  %v1368_v39 = vld [vmem:[#allocation8 + $0x34c] ss:$28 sps:$4 sm:$0xff]   ;;  %v1360_v40 = vld [vmem:[#allocation8 + $0x44] ss:$28 sps:$4 sm:$0xff]   ;;  %v1374_v43 = vld [vmem:[#allocation8 + $0x314] ss:$28 sps:$4 sm:$0xff]  }
  0x42   :  { %154 = vmatpush1.bf16.msra.mxu0 %v1319_v11  ;;  %933 = vmatprep.subr.bf16.mxu1 %v1338_v19  ;;  %v1373_v41 = vld [vmem:[#allocation8 + $0x348] ss:$28 sps:$4 sm:$0xff]   ;;  %v1358_v42 = vld [vmem:[#allocation8 + $0x40] ss:$28 sps:$4 sm:$0xff]   ;;  %v1372_v46 = vld [vmem:[#allocation8 + $0x354] ss:$28 sps:$4 sm:$0xff]  }
  0x43   :  { %968 = vmatprep.subr.bf16.mxu0 %v1324_v15  ;;  %v1366_v44 = vld [vmem:[#allocation8 + $0xc] ss:$28 sps:$4 sm:$0xff]   ;;  %v1380_v48 = vld [vmem:[#allocation8 + $0x2dc] ss:$28 sps:$4 sm:$0xff]   ;;  %v1386_v51 = vld [vmem:[#allocation8 + $0x2a4] ss:$28 sps:$4 sm:$0xff]  }
  0x44   :  { %v1364_v45 = vld [vmem:[#allocation8 + $0x8] ss:$28 sps:$4 sm:$0xff]   ;;  %v1379_v47 = vld [vmem:[#allocation8 + $0x310] ss:$28 sps:$4 sm:$0xff]   ;;  %v1385_v49 = vld [vmem:[#allocation8 + $0x2d8] ss:$28 sps:$4 sm:$0xff]  }
  0x45   :  { %1155 = vmatmul.mubr.msk.bf16.vlgmr.msra.gmra.mxu0 %vm135_vm0, %v74_v16  ;;  %934 = vmatpush1.bf16.msra.mxu1 %v1343_v22  ;;  %v1370_v50 = vld [vmem:[#allocation8 + $0x350] ss:$28 sps:$4 sm:$0xff]   ;;  %v1378_v52 = vld [vmem:[#allocation8 + $0x31c] ss:$28 sps:$4 sm:$0xff]   ;;  %v1384_v56 = vld [vmem:[#allocation8 + $0x2e4] ss:$28 sps:$4 sm:$0xff]  }
  0x46   :  { %969 = vmatpush1.bf16.msra.mxu0 %v1322_v18  ;;  %935 = vmatprep.subr.bf16.mxu1 %v1344_v23  ;;  %v1391_v53 = vld [vmem:[#allocation8 + $0x2a0] ss:$28 sps:$4 sm:$0xff]   ;;  %v1376_v54 = vld [vmem:[#allocation8 + $0x318] ss:$28 sps:$4 sm:$0xff]   ;;  %v1392_v55 = vld [vmem:[#allocation8 + $0x26c] ss:$28 sps:$4 sm:$0xff]  }
  0x47   :  { %970 = vmatprep.subr.bf16.mxu0 %v1330_v20  ;;  %v1397_v57 = vld [vmem:[#allocation8 + $0x268] ss:$28 sps:$4 sm:$0xff]   ;;  %v1382_v58 = vld [vmem:[#allocation8 + $0x2e0] ss:$28 sps:$4 sm:$0xff]   ;;  %v1398_v59 = vld [vmem:[#allocation8 + $0x234] ss:$28 sps:$4 sm:$0xff]  }
  0x48   :  { %v1390_v60 = vld [vmem:[#allocation8 + $0x2ac] ss:$28 sps:$4 sm:$0xff]   ;;  %v1396_v62 = vld [vmem:[#allocation8 + $0x274] ss:$28 sps:$4 sm:$0xff]   ;;  %v1402_v0 = vld [vmem:[#allocation8 + $0x23c] ss:$28 sps:$4 sm:$0xff]  }
  0x49   :  { %936 = vmatpush1.bf16.msra.mxu1 %v1349_v25  ;;  %v1388_v61 = vld [vmem:[#allocation8 + $0x2a8] ss:$28 sps:$4 sm:$0xff]   ;;  %v1394_v63 = vld [vmem:[#allocation8 + $0x270] ss:$28 sps:$4 sm:$0xff]   ;;  %v1400_v1 = vld [vmem:[#allocation8 + $0x238] ss:$28 sps:$4 sm:$0xff]  }
  0x4a   :  { %971 = vmatpush1.bf16.msra.mxu0 %v1328_v21  ;;  %937 = vmatprep.subr.bf16.mxu1 %v1350_v27  ;;  %v1403_v2 = vld [vmem:[#allocation8 + $0x230] ss:$28 sps:$4 sm:$0xff]   ;;  %v1404_v3 = vld [vmem:[#allocation8 + $0x1fc] ss:$28 sps:$4 sm:$0xff]   ;;  %v1408_v4 = vld [vmem:[#allocation8 + $0x204] ss:$28 sps:$4 sm:$0xff]  }
  0x4b   :  { %972 = vmatprep.subr.bf16.mxu0 %v1336_v24  ;;  %v1406_v5 = vld [vmem:[#allocation8 + $0x200] ss:$28 sps:$4 sm:$0xff]   ;;  %v1409_v6 = vld [vmem:[#allocation8 + $0x1f8] ss:$28 sps:$4 sm:$0xff]   ;;  %v1414_v8 = vld [vmem:[#allocation8 + $0x1cc] ss:$28 sps:$4 sm:$0xff]  }
  0x4c   :  { %v1410_v7 = vld [vmem:[#allocation8 + $0x1c4] ss:$28 sps:$4 sm:$0xff]   ;;  %v1418_v11 = vld [vmem:[#allocation8 + $0x19c] ss:$28 sps:$4 sm:$0xff]   ;;  %v1654_v14 = vshrl.u32 %v85_v13, 7 }
  0x4d   :  { %938 = vmatpush1.bf16.msra.mxu1 %v1355_v30  ;;  %v1412_v9 = vld [vmem:[#allocation8 + $0x1c8] ss:$28 sps:$4 sm:$0xff]   ;;  %v1415_v10 = vld [vmem:[#allocation8 + $0x1c0] ss:$28 sps:$4 sm:$0xff]   ;;  %v1477_v13 = vld [vmem:[#allocation8 + $0x1d0] ss:$28 sps:$4 sm:$0xff]  }
  0x4e   :  { %973 = vmatpush1.bf16.msra.mxu0 %v1334_v26  ;;  %939 = vmatprep.subr.bf16.mxu1 %v1356_v31  ;;  %v1419_v12 = vld [vmem:[#allocation8 + $0x360] ss:$28 sps:$4 sm:$0xff]   ;;  %v87_v15 = vsub.s32 0, %v1654_v14  ;;  %v91_v17 = vsub.s32 1, %v1654_v14  ;;  %v1416_v31 = vld [vmem:[#allocation8 + $0x198] ss:$28 sps:$4 sm:$0xff]  }
  0x4f   :  { %974 = vmatprep.subr.bf16.mxu0 %v1342_v28  ;;  %v83_v16 = vld [vmem:[#allocation7] sm:$0x3] }
  0x50   :  { %v88_v18 = vrot.slane %v83_v16, %v87_v15  ;;  %v92_v19 = vrot.slane %v83_v16, %v91_v17  ;;  %v326_v16 = vsub.s32 2, %v1654_v14 }
  0x51   :  { %940 = vmatpush1.bf16.msra.mxu1 %v1361_v33 }
  0x52   :  { %975 = vmatpush1.bf16.msra.mxu0 %v1340_v29  ;;  %941 = vmatprep.subr.bf16.mxu1 %v1362_v35  ;;  %v1424_v35 = vld [vmem:[#allocation8 + $0x328] ss:$28 sps:$4 sm:$0xff]  }
  0x53   :  { %976 = vmatprep.subr.bf16.mxu0 %v1348_v32  ;;  %v1420_v32 = vld [vmem:[#allocation8 + $0x1a0] ss:$28 sps:$4 sm:$0xff]  }
  0x55   :  { %942 = vmatpush1.bf16.msra.mxu1 %v1367_v38  ;;  %v1428_v38 = vld [vmem:[#allocation8 + $0x12c] ss:$28 sps:$4 sm:$0xff]  }
  0x56   :  { %977 = vmatpush1.bf16.msra.mxu0 %v1346_v34  ;;  %943 = vmatprep.subr.bf16.mxu1 %v1368_v39  ;;  %v1423_v34 = vld [vmem:[#allocation8 + $0x164] ss:$28 sps:$4 sm:$0xff]   ;;  %v1429_v39 = vld [vmem:[#allocation8 + $0x2f0] ss:$28 sps:$4 sm:$0xff]  }
  0x57   :  { %978 = vmatprep.subr.bf16.mxu0 %v1354_v36  ;;  %v1421_v36 = vld [vmem:[#allocation8 + $0x160] ss:$28 sps:$4 sm:$0xff]  }
  0x59   :  { %944 = vmatpush2.bf16.msra.mxu1 %v1373_v41  ;;  %v1430_v41 = vld [vmem:[#allocation8 + $0x130] ss:$28 sps:$4 sm:$0xff]  }
  0x5a   :  { %979 = vmatpush1.bf16.msra.mxu0 %v1352_v37  ;;  %945 = vmatprep.subr.bf16.mxu1 %v1374_v43  ;;  %v1425_v37 = vld [vmem:[#allocation8 + $0x168] ss:$28 sps:$4 sm:$0xff]   ;;  %v1434_v43 = vld [vmem:[#allocation8 + $0x2b8] ss:$28 sps:$4 sm:$0xff]  }
  0x5b   :  { %980 = vmatprep.subr.bf16.mxu0 %v1360_v40  ;;  %v1426_v40 = vld [vmem:[#allocation8 + $0x128] ss:$28 sps:$4 sm:$0xff]  }
  0x5d   :  { %946 = vmatpush2.bf16.msra.mxu1 %v1379_v47  ;;  %v1439_v47 = vld [vmem:[#allocation8 + $0x280] ss:$28 sps:$4 sm:$0xff]  }
  0x5e   :  { %981 = vmatpush1.bf16.msra.mxu0 %v1358_v42  ;;  %947 = vmatprep.subr.bf16.mxu1 %v1380_v48  ;;  %v1433_v42 = vld [vmem:[#allocation8 + $0xf4] ss:$28 sps:$4 sm:$0xff]  }
  0x5f   :  { %982 = vmatprep.subr.bf16.mxu0 %v1366_v44  ;;  %v1431_v44 = vld [vmem:[#allocation8 + $0xf0] ss:$28 sps:$4 sm:$0xff]   ;;  %v1436_v48 = vld [vmem:[#allocation8 + $0xb8] ss:$28 sps:$4 sm:$0xff]  }
  0x61   :  { %948 = vmatpush2.bf16.msra.mxu1 %v1385_v49  ;;  %v1440_v49 = vld [vmem:[#allocation8 + $0xc0] ss:$28 sps:$4 sm:$0xff]  }
  0x62   :  { %983 = vmatpush1.bf16.msra.mxu0 %v1364_v45  ;;  %949 = vmatprep.subr.bf16.mxu1 %v1386_v51  ;;  %v1435_v45 = vld [vmem:[#allocation8 + $0xf8] ss:$28 sps:$4 sm:$0xff]   ;;  %v1444_v51 = vld [vmem:[#allocation8 + $0x248] ss:$28 sps:$4 sm:$0xff]  }
  0x63   :  { %984 = vmatprep.subr.bf16.mxu0 %v1372_v46  ;;  %v1438_v46 = vld [vmem:[#allocation8 + $0xbc] ss:$28 sps:$4 sm:$0xff]  }
  0x65   :  { %950 = vmatpush2.bf16.msra.mxu1 %v1391_v53  ;;  %v1445_v53 = vld [vmem:[#allocation8 + $0x88] ss:$28 sps:$4 sm:$0xff]  }
  0x66   :  { %985 = vmatpush2.bf16.msra.mxu0 %v1370_v50  ;;  %951 = vmatprep.subr.bf16.mxu1 %v1392_v55  ;;  %v1443_v50 = vld [vmem:[#allocation8 + $0x84] ss:$28 sps:$4 sm:$0xff]   ;;  %v1449_v55 = vld [vmem:[#allocation8 + $0x210] ss:$28 sps:$4 sm:$0xff]  }
  0x67   :  { %986 = vmatprep.subr.bf16.mxu0 %v1378_v52  ;;  %v1441_v52 = vld [vmem:[#allocation8 + $0x80] ss:$28 sps:$4 sm:$0xff]  }
  0x69   :  { %952 = vmatpush2.bf16.msra.mxu1 %v1397_v57  ;;  %v1450_v57 = vld [vmem:[#allocation8 + $0x50] ss:$28 sps:$4 sm:$0xff]  }
  0x6a   :  { %987 = vmatpush2.bf16.msra.mxu0 %v1376_v54  ;;  %953 = vmatprep.subr.bf16.mxu1 %v1398_v59  ;;  %v1448_v54 = vld [vmem:[#allocation8 + $0x4c] ss:$28 sps:$4 sm:$0xff]   ;;  %v1454_v59 = vld [vmem:[#allocation8 + $0x1d8] ss:$28 sps:$4 sm:$0xff]  }
  0x6b   :  { %988 = vmatprep.subr.bf16.mxu0 %v1384_v56  ;;  %v1446_v56 = vld [vmem:[#allocation8 + $0x48] ss:$28 sps:$4 sm:$0xff]  }
  0x6d   :  { %954 = vmatpush2.bf16.msra.mxu1 %v1403_v2  ;;  %v1464_v2 = vld [vmem:[#allocation8 + $0x2ec] ss:$28 sps:$4 sm:$0xff]  }
  0x6e   :  { %989 = vmatpush2.bf16.msra.mxu0 %v1382_v58  ;;  %955 = vmatprep.subr.bf16.mxu1 %v1404_v3  ;;  %v1453_v58 = vld [vmem:[#allocation8 + $0x14] ss:$28 sps:$4 sm:$0xff]   ;;  %v1462_v3 = vld [vmem:[#allocation8 + $0x2e8] ss:$28 sps:$4 sm:$0xff]  }
  0x6f   :  { %990 = vmatprep.subr.bf16.mxu0 %v1390_v60  ;;  %v1451_v60 = vld [vmem:[#allocation8 + $0x10] ss:$28 sps:$4 sm:$0xff]  }
  0x71   :  { %956 = vmatpush2.bf16.msra.mxu1 %v1409_v6  ;;  %v1470_v6 = vld [vmem:[#allocation8 + $0x27c] ss:$28 sps:$4 sm:$0xff]  }
  0x72   :  { %991 = vmatpush2.bf16.msra.mxu0 %v1388_v61  ;;  %957 = vmatprep.subr.bf16.mxu1 %v1410_v7  ;;  %v1455_v61 = vld [vmem:[#allocation8 + $0x18] ss:$28 sps:$4 sm:$0xff]  }
  0x73   :  { %992 = vmatprep.subr.bf16.mxu0 %v1396_v62  ;;  %v1458_v62 = vld [vmem:[#allocation8 + $0x35c] ss:$28 sps:$4 sm:$0xff]  }
  0x74   :  { %v1468_v7 = vld [vmem:[#allocation8 + $0x278] ss:$28 sps:$4 sm:$0xff]  }
  0x75   :  { %958 = vmatpush2.bf16.msra.mxu1 %v1415_v10  ;;  %v1476_v10 = vld [vmem:[#allocation8 + $0x20c] ss:$28 sps:$4 sm:$0xff]  }
  0x76   :  { %993 = vmatpush2.bf16.msra.mxu0 %v1394_v63  ;;  %1009 = vmatprep.subr.bf16.mxu1 %v1418_v11  ;;  %v1456_v63 = vld [vmem:[#allocation8 + $0x358] ss:$28 sps:$4 sm:$0xff]   ;;  %v1474_v11 = vld [vmem:[#allocation8 + $0x208] ss:$28 sps:$4 sm:$0xff]  }
  0x77   :  { %994 = vmatprep.subr.bf16.mxu0 %v1402_v0  ;;  %v1461_v0 = vld [vmem:[#allocation8 + $0x324] ss:$28 sps:$4 sm:$0xff]  }
  0x7a   :  { %995 = vmatpush2.bf16.msra.mxu0 %v1400_v1  ;;  %v1459_v1 = vld [vmem:[#allocation8 + $0x320] ss:$28 sps:$4 sm:$0xff]  }
  0x7b   :  { %996 = vmatprep.subr.bf16.mxu0 %v1408_v4  ;;  %v1467_v4 = vld [vmem:[#allocation8 + $0x2b4] ss:$28 sps:$4 sm:$0xff]  }
  0x7e   :  { %997 = vmatpush2.bf16.msra.mxu0 %v1406_v5  ;;  %v1465_v5 = vld [vmem:[#allocation8 + $0x2b0] ss:$28 sps:$4 sm:$0xff]  }
  0x7f   :  { %998 = vmatprep.subr.bf16.mxu0 %v1414_v8  ;;  %v1473_v8 = vld [vmem:[#allocation8 + $0x244] ss:$28 sps:$4 sm:$0xff]  }
  0x82   :  { %999 = vmatpush2.bf16.msra.mxu0 %v1412_v9  ;;  %v1471_v9 = vld [vmem:[#allocation8 + $0x240] ss:$28 sps:$4 sm:$0xff]  }
  0x83   :  { %1276 = vmatprep.subr.bf16.mxu0 %v1419_v12  ;;  %v1479_v12 = vld [vmem:[#allocation8 + $0x1d4] ss:$28 sps:$4 sm:$0xff]  }
 0x105   :  { %v173_v20 = vpop.f32.mrf.mxu0 }
 0x106   :  { %v174_v21 = vadd.f32 %v173_v20, %v88_v18  ;;  %v314_v18 = vld [vmem:[%s1687_s4] sm:$0xff]  ;;  %s1611_s4 = smov [#allocation10]  }
 0x107   :  { %v175_v22 = vpop.f32.mrf.mxu0  ;;  %v319_v20 = vrot.slane %v314_v18, %v87_v15  ;;  %s1136_s15 = sshll.u32 %s1611_s4, 4  ;;  %s1137_s15 = int_to_ptr.vmem [resolvable:$true] %s1136_s15 }
 0x108   :  { %v180_v23 = vmul.f32 0.01, %v174_v21  ;;  %v176_v24 = vadd.f32 %v175_v22, %v92_v19  ;;  %v330_v19 = vsub.s32 3, %v1654_v14  ;;  %v323_v22 = vrot.slane %v314_v18, %v91_v17  ;;  %s1574_s16 = scalar_lea.vmem %s1137_s15, 448  ;;  %p1579_p7 = scmp.lt.s32.totalorder %s1137_s15, %s1137_s15 }
 0x109   :  { %v177_v25 = vpop.f32.mrf.mxu0  ;;  %p1575_p6 = scmp.ne.s32.totalorder %s1137_s15, %s1574_s16  ;;  %p1580_p8 = scmp.lt.s32.totalorder %s1574_s16, %s1574_s16 }
 0x10a   :  { %v181_v26 = vmul.f32 0.01, %v176_v24  ;;  %v182_v27 = vmax.f32 %v174_v21, %v180_v23  ;;  %v327_v21 = vrot.slane %v314_v18, %v326_v16  ;;  %v331_v23 = vrot.slane %v314_v18, %v330_v19 }
 0x10b   :  { %v178_v28 = vpop.f32.mrf.mxu0  ;;  %p1581_p9 = por %p1580_p8, %p1579_p7 }
 0x10c   :  { %v183_v29 = vmax.f32 %v176_v24, %v181_v26  ;;  %v1662_v33 = vpack.c.bf16 %v182_v27, %v182_v27 }
 0x10d   :  { %p1582_p10 = pnand %p1581_p9, %p1575_p6 }
 0x10e   :  { %v185_v30 = vpack.c.bf16 %v183_v29, %v183_v29 }
 0x110   :  { %959 = vmatprep.mubr.bf16.mxu1 %v185_v30  ;;  %1000 = vmatprep.mubr.bf16.mxu0 %v185_v30 }
 0x111   :  { %960 = vmatmul.mubr.bf16.vlgmr.msra.gmra.mxu1 %v1662_v33  ;;  %1001 = vmatmul.mubr.bf16.vlgmr.msra.gmra.mxu0 %v1662_v33 }
 0x112   :  { %1010 = vmatpush1.bf16.msra.mxu1 %v1416_v31  ;;  %1277 = vmatpush3.bf16.msra.mxu0 %v1420_v32 }
 0x113   :  { %1041 = vmatprep.mubr.bf16.mxu1 %v185_v30  ;;  %1082 = vmatprep.mubr.bf16.mxu0 %v185_v30 }
 0x114   :  { %1011 = vmatprep.subr.bf16.mxu1 %v1423_v34  ;;  %1278 = vmatprep.subr.bf16.mxu0 %v1424_v35 }
 0x116   :  { %1012 = vmatpush1.bf16.msra.mxu1 %v1421_v36  ;;  %1279 = vmatpush3.bf16.msra.mxu0 %v1425_v37 }
 0x117   :  { %1013 = vmatprep.subr.bf16.mxu1 %v1428_v38  ;;  %1280 = vmatprep.subr.bf16.mxu0 %v1429_v39 }
 0x11a   :  { %1014 = vmatpush1.bf16.msra.mxu1 %v1426_v40  ;;  %1281 = vmatpush3.bf16.msra.mxu0 %v1430_v41  ;;  %v342_v40 = vsub.s32 6, %v1654_v14 }
 0x11b   :  { %1015 = vmatprep.subr.bf16.mxu1 %v1433_v42  ;;  %1282 = vmatprep.subr.bf16.mxu0 %v1434_v43 }
 0x11c   :  { %v343_v42 = vrot.slane %v314_v18, %v342_v40 }
 0x11e   :  { %1016 = vmatpush1.bf16.msra.mxu1 %v1431_v44  ;;  %1283 = vmatpush3.bf16.msra.mxu0 %v1435_v45 }
 0x11f   :  { %1017 = vmatprep.subr.bf16.mxu1 %v1438_v46  ;;  %1284 = vmatprep.subr.bf16.mxu0 %v1439_v47 }
 0x122   :  { %1018 = vmatpush1.bf16.msra.mxu1 %v1436_v48  ;;  %1285 = vmatpush3.bf16.msra.mxu0 %v1440_v49 }
 0x123   :  { %1019 = vmatprep.subr.bf16.mxu1 %v1443_v50  ;;  %1286 = vmatprep.subr.bf16.mxu0 %v1444_v51  ;;  %v334_v50 = vsub.s32 4, %v1654_v14  ;;  %v338_v51 = vsub.s32 5, %v1654_v14 }
 0x126   :  { %1020 = vmatpush1.bf16.msra.mxu1 %v1441_v52  ;;  %1287 = vmatpush3.bf16.msra.mxu0 %v1445_v53  ;;  %v335_v52 = vrot.slane %v314_v18, %v334_v50  ;;  %v339_v53 = vrot.slane %v314_v18, %v338_v51 }
 0x127   :  { %1021 = vmatprep.subr.bf16.mxu1 %v1448_v54  ;;  %1288 = vmatprep.subr.bf16.mxu0 %v1449_v55 }
 0x12a   :  { %1022 = vmatpush1.bf16.msra.mxu1 %v1446_v56  ;;  %1289 = vmatpush3.bf16.msra.mxu0 %v1450_v57 }
 0x12b   :  { %1023 = vmatprep.subr.bf16.mxu1 %v1453_v58  ;;  %1290 = vmatprep.subr.bf16.mxu0 %v1454_v59 }
 0x12e   :  { %1024 = vmatpush1.bf16.msra.mxu1 %v1451_v60  ;;  %1291 = vmatpush3.bf16.msra.mxu0 %v1455_v61 }
 0x12f   :  { %1025 = vmatprep.subr.bf16.mxu1 %v1458_v62 }
 0x131   :  { %1083 = vmatmul.mubr.bf16.vlgmr.msra.gmra.mxu0 %v1662_v33 }
 0x132   :  { %1026 = vmatpush2.bf16.msra.mxu1 %v1456_v63 }
 0x133   :  { %1027 = vmatprep.subr.bf16.mxu1 %v1461_v0 }
 0x136   :  { %1028 = vmatpush2.bf16.msra.mxu1 %v1459_v1 }
 0x137   :  { %1029 = vmatprep.subr.bf16.mxu1 %v1464_v2 }
 0x13a   :  { %1030 = vmatpush2.bf16.msra.mxu1 %v1462_v3 }
 0x13b   :  { %1031 = vmatprep.subr.bf16.mxu1 %v1467_v4 }
 0x13e   :  { %1032 = vmatpush2.bf16.msra.mxu1 %v1465_v5 }
 0x13f   :  { %1033 = vmatprep.subr.bf16.mxu1 %v1470_v6 }
 0x142   :  { %1034 = vmatpush2.bf16.msra.mxu1 %v1468_v7 }
 0x143   :  { %1035 = vmatprep.subr.bf16.mxu1 %v1473_v8 }
 0x146   :  { %1036 = vmatpush2.bf16.msra.mxu1 %v1471_v9 }
 0x147   :  { %1037 = vmatprep.subr.bf16.mxu1 %v1476_v10 }
 0x14a   :  { %1038 = vmatpush2.bf16.msra.mxu1 %v1474_v11 }
 0x14b   :  { %1039 = vmatprep.subr.bf16.mxu1 %v1479_v12 }
 0x14e   :  { %1040 = vmatpush2.bf16.msra.mxu1 %v1477_v13 }
 0x151   :  { %1042 = vmatmul.mubr.bf16.vlgmr.msra.gmra.mxu1 %v1662_v33 }
 0x1d1   :  { %v961_v24 = vpop.f32.mrf.mxu1  ;;  %v1002_v25 = vpop.f32.mrf.mxu0 }
 0x1d2   :  { %v962_v26 = vadd.f32 %v961_v24, %v319_v20  ;;  %v1003_v27 = vadd.f32 %v1002_v25, %v327_v21 }
 0x1d3   :  { %v963_v28 = vpop.f32.mrf.mxu1  ;;  %v1004_v29 = vpop.f32.mrf.mxu0 }
 0x1d4   :  { %1480 = vtanh.f32 %v962_v26  ;;  %v964_v30 = vadd.f32 %v963_v28, %v323_v22  ;;  %v1005_v31 = vadd.f32 %v1004_v29, %v331_v23 }
 0x1d5   :  { %1482 = vtanh.f32 %v1003_v27  ;;  %v965_v32 = vpop.f32.mrf.mxu1  ;;  %v1006_v33 = vpop.f32.mrf.mxu0 }
 0x1d6   :  { %1484 = vtanh.f32 %v964_v30 }
 0x1d7   :  { %1486 = vtanh.f32 %v1005_v31  ;;  %v966_v15 = vpop.f32.mrf.mxu1  ;;  %v1007_v34 = vpop.f32.mrf.mxu0 }
 0x1e1   :  { %v1481_v35 = vpop.eup %1480 }
 0x1e2   :  { %v1483_v36 = vpop.eup %1482 }
 0x1e3   :  { %v1485_v17 = vpop.eup %1484 }
 0x1e4   :  { %v1487_v37 = vpop.eup %1486  ;;  %v1272_v38 = vpack.c.bf16 %v1485_v17, %v1481_v35 }
 0x1e5   :  { %v1273_v39 = vpack.c.bf16 %v1487_v37, %v1483_v36 }
 0x1e6   :  { %1126 = vst [vmem:[#allocation10] sm:$0xff] %v1272_v38 }
 0x1e7   :  { %1127 = vst [vmem:[#allocation10 + $0x8] sm:$0xff] %v1273_v39 }
 0x1f1   :  { %v1292_v41 = vpop.f32.mrf.mxu0 }
 0x1f3   :  { %v1293_v43 = vpop.f32.mrf.mxu0 }
 0x1f4   :  { %v1294_v44 = vadd.f32 %v1293_v43, %v1292_v41 }
 0x1f5   :  { %v1295_v45 = vpop.f32.mrf.mxu0 }
 0x1f6   :  { %v1085_v46 = vadd.f32 %v1294_v44, %v343_v42 }
 0x1f7   :  { %v1296_v47 = vpop.f32.mrf.mxu0 }
 0x1f8   :  { %1488 = vtanh.f32 %v1085_v46 }
 0x205   :  { %v1489_v48 = vpop.eup %1488 }
 0x206   :  { %v1275_v49 = vpack.c.bf16 %v1489_v48, %v1489_v48 }
 0x208   :  { %1129 = vst [vmem:[#allocation10 + $0x18] sm:$0xf] %v1275_v49 }
 0x211   :  { %v1043_v54 = vpop.f32.mrf.mxu1 }
 0x212   :  { %v1044_v55 = vadd.f32 %v1043_v54, %v335_v52 }
 0x213   :  { %v1045_v56 = vpop.f32.mrf.mxu1 }
 0x214   :  { %v1046_v57 = vadd.f32 %v1045_v56, %v339_v53  ;;  %1490 = vtanh.f32 %v1044_v55 }
 0x215   :  { %v1047_v58 = vpop.f32.mrf.mxu1 }
 0x216   :  { %1492 = vtanh.f32 %v1046_v57 }
 0x217   :  { %v1048_v59 = vpop.f32.mrf.mxu1 }
 0x221   :  { %v1491_v60 = vpop.eup %1490 }
 0x223   :  { %v1493_v61 = vpop.eup %1492 }
 0x224   :  { %v1274_v62 = vpack.c.bf16 %v1493_v61, %v1491_v60 }
 0x226   :  { %1128 = vst [vmem:[#allocation10 + $0x10] sm:$0xff] %v1274_v62 }
 0x227   :  { %1585 = shalt.err (!%p1582_p10)
}
 0x228   :  { %1139 = dma.vmem_to_hbm [thread:$0]  %s1137_s15, 448, %s1688_s5, [#allocation4]  }
 0x229   :  { %1600 = dma.done.wait [#allocation4], 448  }
 0x22a   :  { %1601 = vsyncadd [#allocation4], 4294966848 }
 0x22b   :  { %1143 = vsyncpa [#allocation3], 1 }
 0x22c   :  { %1144 = vsyncpa [#allocation6], 1 }
 0x22d   :  { %1145 = vsyncpa [#allocation9], 1 }
 0x22e   :  { %1146 = vsyncpa [#allocation4], 1 }

</bundles_post_ra>
